<compile_context>
chip_gen: v7x
topology: tpu7x:2x2x1
jax: 0.10.0
libtpu: 0.0.40
codegen_flags: <defaults>
</compile_context>

<pallas_src>
import jax
import jax.numpy as jnp
from jax import lax
from jax.experimental import pallas as pl
from jax.experimental.pallas import tpu as pltpu

NEG_INF = -1000000.0


def tagger_kernel(e_ref, m_ref, wconv_ref, bconv_ref, wpred_ref, bpred_ref,
                  packed_ref, hid_ref):
    TB, S, E = e_ref.shape
    KE, H = wconv_ref.shape
    K = KE // E
    pad = (K - 1) // 2                      # PyTorch 'same': left pad = (K-1)//2
    M = TB * S

    # ---- im2col built entirely in vregs (no VMEM scratch round-trip) -------
    e_blk = e_ref[...]                                    # (TB, S, E) f32
    taps = []
    for k in range(K):                                    # K is small & static
        sh = k - pad                                      # shift of tap k
        lo = max(0, -sh)                                  # first valid output row
        hi = min(S, S - sh)                               # one past last valid row
        parts = []
        if lo > 0:
            parts.append(jnp.zeros((TB, lo, E), e_blk.dtype))
        parts.append(e_blk[:, lo + sh:hi + sh, :])        # static sublane slice
        if hi < S:
            parts.append(jnp.zeros((TB, S - hi, E), e_blk.dtype))
        taps.append(parts[0] if len(parts) == 1 else jnp.concatenate(parts, axis=1))
    lhs = taps[0] if K == 1 else jnp.concatenate(taps, axis=-1)     # (TB, S, K*E)
    lhs = lhs.reshape(M, KE).astype(jnp.bfloat16)
    # TODO(synk): for very large TB*S*K*E (hundreds of KiB) split this into per-tap
    # matmuls or a lane-aligned staging buffer to bound vreg pressure.

    # ---- Conv1d == ONE bf16 MXU matmul over the whole batch block ----------
    acc = jnp.dot(lhs, wconv_ref[...],
                  preferred_element_type=jnp.float32)     # (M, H) f32 accumulate
    h = jnp.maximum(acc + bconv_ref[...], 0.0)            # bias (1, H) + ReLU, f32
    hid_ref[...] = h.reshape(TB, S, H)                    # PyTorch (B, S, H) layout

    # ---- predictor: wpred (8, H) x h (M, H)^T -> (8, M), tokens on LANES ---
    zs_rows = lax.dot_general(wpred_ref[...], h, (((1,), (1,)), ((), ())),
                              preferred_element_type=jnp.float32)   # (8, M) f32
    zs0 = zs_rows[0:1, :] + bpred_ref[0]                  # (1, M)
    zs1 = zs_rows[1:2, :] + bpred_ref[1]                  # (1, M)

    # mask padded tokens on the class-1 logit only
    zs1 = zs1 + (1.0 - m_ref[...]) * NEG_INF              # m_ref is (1, M)

    # ---- 2-class softmax + argmax == logistic on the logit difference ------
    d = zs1 - zs0
    z = jnp.where(d > 0.0, 1.0, 0.0)                      # eval-mode argmax (ties -> 0)
    nlp = jnp.log(1.0 + jnp.exp(-jnp.abs(d)))             # -log p(selected), 1 EUP exp

    # single lane-dense merged store: rows = [z, nlp, zs0, zs1]
    packed_ref[...] = jnp.concatenate([z, nlp, zs0, zs1], axis=0)   # (4, M)
    # TODO(synk): training-mode Categorical sampling (pltpu.prng_*) not implemented;
    # this reproduces the deterministic eval-mode path.


def _pick_tb(B, S, target_rows=512):
    """Sequences per grid step: M = TB*S ~ target_rows, TB divides B."""
    tb = max(1, min(B, max(1, target_rows // max(1, S))))
    while B % tb:
        tb -= 1
    # prefer >= 2 grid steps (v7x megacore) if each step still gets >= 256 rows
    if B // tb < 2:
        for cand in range(tb // 2, 0, -1):
            if B % cand == 0 and cand * S >= 256:
                tb = cand
                break
    return tb


def tagger_forward(e, m, w_conv_torch, b_conv, w_pred_torch, b_pred):
    """e: (B,S,E) f32, m: (B,S) f32, conv weight (H,E,K) torch layout,
    conv bias (H,), linear weight (2,H) torch layout, linear bias (2,)."""
    B, S, E = e.shape
    H, _, K = w_conv_torch.shape

    TB = _pick_tb(B, S)
    NB = B // TB
    M = TB * S

    # one-time parameter / input re-layouts (tiny, plain XLA)
    w_conv = (jnp.transpose(w_conv_torch, (2, 1, 0))
              .reshape(K * E, H).astype(jnp.bfloat16))              # (K*E, H) bf16
    b_conv2 = b_conv.reshape(1, H).astype(jnp.float32)
    w_pred_pad = jnp.zeros((8, H), jnp.float32).at[:2, :].set(w_pred_torch)
    m3 = m.astype(jnp.float32).reshape(NB, 1, M)                    # token-on-lanes rows

    out_shapes = (
        jax.ShapeDtypeStruct((NB, 4, M), jnp.float32),   # packed [z, nlp, zs0, zs1]
        jax.ShapeDtypeStruct((B, S, H), jnp.float32),    # hiddens (PyTorch layout)
    )
    in_specs = [
        pl.BlockSpec((TB, S, E), lambda b: (b, 0, 0)),                       # e (f32)
        pl.BlockSpec((None, 1, M), lambda b: (b, 0, 0)),                     # mask row
        pl.BlockSpec((K * E, H), lambda b: (0, 0)),                          # conv W (resident, bf16)
        pl.BlockSpec((1, H), lambda b: (0, 0)),                              # conv bias
        pl.BlockSpec((8, H), lambda b: (0, 0)),                              # pred W (padded to 8 rows)
        pl.BlockSpec((2,), lambda b: (0,),
                     memory_space=pltpu.MemorySpace.SMEM),                   # pred bias scalars
    ]
    out_specs = (
        pl.BlockSpec((None, 4, M), lambda b: (b, 0, 0)),
        pl.BlockSpec((TB, S, H), lambda b: (b, 0, 0)),
    )

    packed, hid = pl.pallas_call(
        tagger_kernel,
        grid=(NB,),
        out_shape=out_shapes,
        in_specs=in_specs,
        out_specs=out_specs,
        compiler_params=pltpu.CompilerParams(
            dimension_semantics=("parallel",),           # megacore sharding on v7x
            vmem_limit_bytes=32 * 1024 * 1024,           # plenty for these tiles, safe on all gens
        ),
    )(e, m3, w_conv, b_conv2, w_pred_pad, b_pred.astype(jnp.float32))

    z = packed[:, 0, :].reshape(B, S)
    neg_log_probs = packed[:, 1, :].reshape(B, S)
    zs0 = packed[:, 2, :].reshape(B, S)
    zs1 = packed[:, 3, :].reshape(B, S)
    z_scores = jnp.stack([zs0, zs1], axis=-1)            # (B, S, 2)
    return z, neg_log_probs, z_scores, hid


def tagger_reference(e, m, w_conv_torch, b_conv, w_pred_torch, b_pred):
    """Pure-JAX f32 reference mirroring the PyTorch forward (eval mode)."""
    H, E, K = w_conv_torch.shape
    pad = (K - 1) // 2
    x = jnp.transpose(e, (0, 2, 1))                                   # (B, E, S) NCW
    y = lax.conv_general_dilated(x, w_conv_torch, (1,), [(pad, K - 1 - pad)],
                                 dimension_numbers=('NCH', 'OIH', 'NCH'))
    y = y + b_conv[None, :, None]
    hiddens = jnp.maximum(jnp.transpose(y, (0, 2, 1)), 0.0)           # (B, S, H)
    zs = hiddens @ w_pred_torch.T + b_pred                            # (B, S, 2)
    zs = zs.at[:, :, 1].add((1.0 - m) * NEG_INF)
    probs = jax.nn.softmax(zs, axis=-1)
    z = (zs[:, :, 1] > zs[:, :, 0]).astype(jnp.float32)
    p_sel = jnp.where(z == 1.0, probs[:, :, 1], probs[:, :, 0])
    return z, -jnp.log(p_sel), zs, hiddens


if __name__ == "__main__":
    B, S, E, H, K = 2, 8, 32, 32, 3

    key = jax.random.PRNGKey(0)
    k_e, k_wc, k_bc, k_wp, k_bp = jax.random.split(key, 5)

    e = jax.random.normal(k_e, (B, S, E), dtype=jnp.float32)
    # mask: first 6 tokens valid, last 2 padding
    m = jnp.concatenate([jnp.ones((B, 6), jnp.float32),
                         jnp.zeros((B, 2), jnp.float32)], axis=1)

    # Deterministic synthetic parameters (shapes as in the PyTorch __init__).
    w_conv = 0.1 * jax.random.normal(k_wc, (H, E, K), dtype=jnp.float32)   # Conv1d weight
    b_conv = 0.1 * jax.random.normal(k_bc, (H,), dtype=jnp.float32)
    w_pred = 0.1 * jax.random.normal(k_wp, (2, H), dtype=jnp.float32)      # Linear weight
    b_pred = 0.1 * jax.random.normal(k_bp, (2,), dtype=jnp.float32)

    z, nlp, zs, hid = jax.block_until_ready(
        tagger_forward(e, m, w_conv, b_conv, w_pred, b_pred))

    z_r, nlp_r, zs_r, hid_r = tagger_reference(e, m, w_conv, b_conv, w_pred, b_pred)

    # bf16 MXU operands (f32 accumulation) -> relaxed tolerances vs f32 reference.
    assert bool(jnp.allclose(hid, hid_r, atol=5e-2, rtol=5e-2))
    assert bool(jnp.allclose(zs, zs_r, atol=5e-2, rtol=1e-3))
    d_ref = zs_r[:, :, 1] - zs_r[:, :, 0]
    near_tie = jnp.abs(d_ref) < 1e-1
    assert bool(jnp.all((z == z_r) | near_tie))          # argmax may differ only on near-ties
    assert bool(jnp.allclose(nlp, nlp_r, atol=5e-2, rtol=1e-3))

    print("KERNEL_OK")
</pallas_src>

<mosaic_0001>
module attributes {stable_mosaic.version = 11 : i64} {
  func.func @tagger_kernel(%arg0: i32, %arg1: memref<2x8x32xf32, #tpu.memory_space<vmem>>, %arg2: memref<1x1x16xf32, #tpu.memory_space<vmem>>, %arg3: memref<96x32xbf16, #tpu.memory_space<vmem>>, %arg4: memref<1x32xf32, #tpu.memory_space<vmem>>, %arg5: memref<8x32xf32, #tpu.memory_space<vmem>>, %arg6: memref<2xf32, #tpu.memory_space<smem>>, %arg7: memref<1x4x16xf32, #tpu.memory_space<vmem>>, %arg8: memref<2x8x32xf32, #tpu.memory_space<vmem>>) attributes {dimension_semantics = [#tpu.dimension_semantics<parallel>], iteration_bounds = array<i64: 1>, scalar_prefetch = 0 : i64, scratch_operands = 0 : i64, tpu.core_type = #tpu.core_type<tc>, window_params = [{transform_indices = @transform_0, window_bounds = array<i64: 2, 8, 32>}, {transform_indices = @transform_1, window_bounds = array<i64: 1, 1, 16>}, {pipeline_mode = #tpu.pipeline_mode<synchronous>, transform_indices = @transform_2, window_bounds = array<i64: 96, 32>}, {pipeline_mode = #tpu.pipeline_mode<synchronous>, transform_indices = @transform_3, window_bounds = array<i64: 1, 32>}, {pipeline_mode = #tpu.pipeline_mode<synchronous>, transform_indices = @transform_4, window_bounds = array<i64: 8, 32>}, {transform_indices = @transform_5, window_bounds = array<i64: 2>}, {transform_indices = @transform_6, window_bounds = array<i64: 1, 4, 16>}, {transform_indices = @transform_7, window_bounds = array<i64: 2, 8, 32>}]} {
    %c0 = arith.constant 0 : index
    %c0_0 = arith.constant 0 : index
    %c0_1 = arith.constant 0 : index
    %0 = vector.load %arg1[%c0, %c0_0, %c0_1] : memref<2x8x32xf32, #tpu.memory_space<vmem>>, vector<2x8x32xf32>
    %cst = arith.constant 0.000000e+00 : f32
    %1 = vector.broadcast %cst : f32 to vector<2x1x32xf32>
    %2 = vector.extract_strided_slice %0 {offsets = [0, 0, 0], sizes = [2, 7, 32], strides = [1, 1, 1]} : vector<2x8x32xf32> to vector<2x7x32xf32>
    %3 = tpu.concatenate %1, %2 in 1 : vector<2x1x32xf32>, vector<2x7x32xf32> -> vector<2x8x32xf32>
    %4 = vector.extract_strided_slice %0 {offsets = [0, 1, 0], sizes = [2, 7, 32], strides = [1, 1, 1]} : vector<2x8x32xf32> to vector<2x7x32xf32>
    %cst_2 = arith.constant 0.000000e+00 : f32
    %5 = vector.broadcast %cst_2 : f32 to vector<2x1x32xf32>
    %6 = tpu.concatenate %4, %5 in 1 : vector<2x7x32xf32>, vector<2x1x32xf32> -> vector<2x8x32xf32>
    %7 = tpu.concatenate %3, %0, %6 in 2 : vector<2x8x32xf32>, vector<2x8x32xf32>, vector<2x8x32xf32> -> vector<2x8x96xf32>
    %8 = vector.shape_cast %7 : vector<2x8x96xf32> to vector<16x96xf32>
    %9 = arith.truncf %8 : vector<16x96xf32> to vector<16x96xbf16>
    %c0_3 = arith.constant 0 : index
    %c0_4 = arith.constant 0 : index
    %10 = vector.load %arg3[%c0_3, %c0_4] : memref<96x32xbf16, #tpu.memory_space<vmem>>, vector<96x32xbf16>
    %cst_5 = arith.constant dense<0.000000e+00> : vector<16x32xf32>
    %11 = tpu.matmul %9, %10, %cst_5 {dimension_numbers = #tpu.dot_dimension_numbers<[1], [0], [0], [1], [0, 0, 1, 1], [], []>} : vector<16x96xbf16>, vector<96x32xbf16>, vector<16x32xf32> -> vector<16x32xf32>
    %c0_6 = arith.constant 0 : index
    %c0_7 = arith.constant 0 : index
    %12 = vector.load %arg4[%c0_6, %c0_7] : memref<1x32xf32, #tpu.memory_space<vmem>>, vector<1x32xf32>
    %13 = vector.broadcast %12 : vector<1x32xf32> to vector<16x32xf32>
    %14 = arith.addf %11, %13 : vector<16x32xf32>
    %cst_8 = arith.constant 0.000000e+00 : f32
    %15 = vector.broadcast %cst_8 : f32 to vector<16x32xf32>
    %16 = arith.maximumf %14, %15 : vector<16x32xf32>
    %17 = vector.shape_cast %16 : vector<16x32xf32> to vector<2x8x32xf32>
    %c0_9 = arith.constant 0 : index
    %c0_10 = arith.constant 0 : index
    %c0_11 = arith.constant 0 : index
    %18 = vector.load %arg8[%c0_9, %c0_10, %c0_11] : memref<2x8x32xf32, #tpu.memory_space<vmem>>, vector<2x8x32xf32>
    tpu.vector_store %arg8[%c0_9, %c0_10, %c0_11], %17 {strides = array<i32>} : memref<2x8x32xf32, #tpu.memory_space<vmem>>, vector<2x8x32xf32>,
    %c0_12 = arith.constant 0 : index
    %c0_13 = arith.constant 0 : index
    %19 = vector.load %arg5[%c0_12, %c0_13] : memref<8x32xf32, #tpu.memory_space<vmem>>, vector<8x32xf32>
    %cst_14 = arith.constant dense<0.000000e+00> : vector<8x16xf32>
    %20 = tpu.matmul %19, %16, %cst_14 {dimension_numbers = #tpu.dot_dimension_numbers<[1], [1], [0], [0], [0, 0, 1, 0], [], []>} : vector<8x32xf32>, vector<16x32xf32>, vector<8x16xf32> -> vector<8x16xf32>
    %21 = vector.extract_strided_slice %20 {offsets = [0, 0], sizes = [1, 16], strides = [1, 1]} : vector<8x16xf32> to vector<1x16xf32>
    %c0_15 = arith.constant 0 : index
    %22 = memref.load %arg6[%c0_15] : memref<2xf32, #tpu.memory_space<smem>>
    %23 = vector.broadcast %22 : f32 to vector<1x16xf32>
    %24 = arith.addf %21, %23 : vector<1x16xf32>
    %25 = vector.extract_strided_slice %20 {offsets = [1, 0], sizes = [1, 16], strides = [1, 1]} : vector<8x16xf32> to vector<1x16xf32>
    %c1 = arith.constant 1 : index
    %26 = memref.load %arg6[%c1] : memref<2xf32, #tpu.memory_space<smem>>
    %27 = vector.broadcast %26 : f32 to vector<1x16xf32>
    %28 = arith.addf %25, %27 : vector<1x16xf32>
    %c0_16 = arith.constant 0 : index
    %c0_17 = arith.constant 0 : index
    %c0_18 = arith.constant 0 : index
    %29 = vector.load %arg2[%c0_16, %c0_17, %c0_18] : memref<1x1x16xf32, #tpu.memory_space<vmem>>, vector<1x1x16xf32>
    %30 = vector.shape_cast %29 : vector<1x1x16xf32> to vector<1x16xf32>
    %cst_19 = arith.constant 1.000000e+00 : f32
    %31 = vector.broadcast %cst_19 : f32 to vector<1x16xf32>
    %32 = arith.subf %31, %30 : vector<1x16xf32>
    %cst_20 = arith.constant -1.000000e+06 : f32
    %33 = vector.broadcast %cst_20 : f32 to vector<1x16xf32>
    %34 = arith.mulf %32, %33 : vector<1x16xf32>
    %35 = arith.addf %28, %34 : vector<1x16xf32>
    %36 = arith.subf %35, %24 : vector<1x16xf32>
    %cst_21 = arith.constant 0.000000e+00 : f32
    %37 = vector.broadcast %cst_21 : f32 to vector<1x16xf32>
    %38 = arith.cmpf ogt, %36, %37 : vector<1x16xf32>
    %cst_22 = arith.constant 1.000000e+00 : f32
    %cst_23 = arith.constant 0.000000e+00 : f32
    %39 = vector.broadcast %cst_22 : f32 to vector<1x16xf32>
    %40 = vector.broadcast %cst_23 : f32 to vector<1x16xf32>
    %41 = arith.select %38, %39, %40 : vector<1x16xi1>, vector<1x16xf32>
    %42 = math.absf %36 : vector<1x16xf32>
    %cst_24 = arith.constant 0.000000e+00 : f32
    %43 = vector.broadcast %cst_24 : f32 to vector<1x16xf32>
    %44 = arith.subf %43, %42 : vector<1x16xf32>
    %45 = math.exp %44 : vector<1x16xf32>
    %cst_25 = arith.constant 1.000000e+00 : f32
    %46 = vector.broadcast %cst_25 : f32 to vector<1x16xf32>
    %47 = arith.addf %46, %45 : vector<1x16xf32>
    %48 = math.log %47 : vector<1x16xf32>
    %49 = tpu.concatenate %41, %48, %24, %35 in 0 : vector<1x16xf32>, vector<1x16xf32>, vector<1x16xf32>, vector<1x16xf32> -> vector<4x16xf32>
    %c0_26 = arith.constant 0 : index
    %c0_27 = arith.constant 0 : index
    %c0_28 = arith.constant 0 : index
    %50 = vector.load %arg7[%c0_26, %c0_27, %c0_28] : memref<1x4x16xf32, #tpu.memory_space<vmem>>, vector<1x4x16xf32>
    %51 = vector.shape_cast %50 : vector<1x4x16xf32> to vector<4x16xf32>
    %52 = vector.shape_cast %49 : vector<4x16xf32> to vector<1x4x16xf32>
    tpu.vector_store %arg7[%c0_26, %c0_27, %c0_28], %52 {strides = array<i32>} : memref<1x4x16xf32, #tpu.memory_space<vmem>>, vector<1x4x16xf32>,
    return
  }
  func.func @transform_0(%arg0: i32) -> (i32, i32, i32) {
    %c0_i32 = arith.constant 0 : i32
    %c0_i32_0 = arith.constant 0 : i32
    %c0_i32_1 = arith.constant 0 : i32
    return %arg0, %c0_i32, %c0_i32_0 : i32, i32, i32
  }
  func.func @transform_1(%arg0: i32) -> (i32, i32, i32) {
    %c0_i32 = arith.constant 0 : i32
    %c0_i32_0 = arith.constant 0 : i32
    %c0_i32_1 = arith.constant 0 : i32
    return %arg0, %c0_i32, %c0_i32_0 : i32, i32, i32
  }
  func.func @transform_2(%arg0: i32) -> (i32, i32) {
    %c0_i32 = arith.constant 0 : i32
    %c0_i32_0 = arith.constant 0 : i32
    %c0_i32_1 = arith.constant 0 : i32
    return %c0_i32, %c0_i32_0 : i32, i32
  }
  func.func @transform_3(%arg0: i32) -> (i32, i32) {
    %c0_i32 = arith.constant 0 : i32
    %c0_i32_0 = arith.constant 0 : i32
    %c0_i32_1 = arith.constant 0 : i32
    return %c0_i32, %c0_i32_0 : i32, i32
  }
  func.func @transform_4(%arg0: i32) -> (i32, i32) {
    %c0_i32 = arith.constant 0 : i32
    %c0_i32_0 = arith.constant 0 : i32
    %c0_i32_1 = arith.constant 0 : i32
    return %c0_i32, %c0_i32_0 : i32, i32
  }
  func.func @transform_5(%arg0: i32) -> i32 {
    %c0_i32 = arith.constant 0 : i32
    %c0_i32_0 = arith.constant 0 : i32
    return %c0_i32 : i32
  }
  func.func @transform_6(%arg0: i32) -> (i32, i32, i32) {
    %c0_i32 = arith.constant 0 : i32
    %c0_i32_0 = arith.constant 0 : i32
    %c0_i32_1 = arith.constant 0 : i32
    return %arg0, %c0_i32, %c0_i32_0 : i32, i32, i32
  }
  func.func @transform_7(%arg0: i32) -> (i32, i32, i32) {
    %c0_i32 = arith.constant 0 : i32
    %c0_i32_0 = arith.constant 0 : i32
    %c0_i32_1 = arith.constant 0 : i32
    return %arg0, %c0_i32, %c0_i32_0 : i32, i32, i32
  }
}

</mosaic_0001>

<bundles_post_ra>
// kernel: tpu_custom_call.1
= control target key start
LH: loop header
LB: loop body
LE: loop exit
PB: predicated region body
PF: predicated region fallthrough
CT: control target
= control target key end

     0   :  { %13 = vsyncpa [#allocation4], 0  ;;  %s609_s0 = inlined_call_operand.vmem [shape: f32[2,8,32], index: 0, kind: input, shape index: {}]   ;;  %s610_s1 = inlined_call_operand.vmem [shape: f32[1,1,16], index: 1, kind: input, shape index: {}]   ;;  %s611_s2 = inlined_call_operand.vmem [shape: bf16[96,32], index: 2, kind: input, shape index: {}]   ;;  %s612_s3 = inlined_call_operand.vmem [shape: f32[1,32], index: 3, kind: input, shape index: {}]   ;;  %s613_s4 = inlined_call_operand.vmem [shape: f32[8,32], index: 4, kind: input, shape index: {}]   ;;  %s614_s5 = inlined_call_operand.vmem [shape: f32[2], index: 5, kind: input, shape index: {}]   ;;  %s615_s6 = inlined_call_operand.hbm [shape: f32[1,4,16], index: 6, kind: output, shape index: {0}]   ;;  %s616_s7 = inlined_call_operand.hbm [shape: f32[2,8,32], index: 7, kind: output, shape index: {1}]  }
   0x1   :  { %14 = vsyncpa [#allocation3], 0 }
   0x2   :  { %15 = vsyncpa [#allocation7], 0  ;;  %s32_s26 = sshll.u32 %s614_s5, 4  ;;  %s33_s26 = int_to_ptr.vmem [resolvable:$true] %s32_s26 }
   0x3   :  { %s418_s27 = scalar_lea.vmem %s33_s26, 16  ;;  %p423_p1 = scmp.lt.s32.totalorder %s33_s26, %s33_s26 }
   0x4   :  { %p419_p0 = scmp.ne.s32.totalorder %s33_s26, %s418_s27  ;;  %p424_p2 = scmp.lt.s32.totalorder %s418_s27, %s418_s27 }
   0x6   :  { %p425_p3 = por %p424_p2, %p423_p1 }
   0x8   :  { %p426_p4 = pnand %p425_p3, %p419_p0 }
   0xa   :  { %429 = shalt.err (!%p426_p4)
}
   0xb   :  { %s480_s28 = smov [#allocation2]  }
   0xc   :  { %35 = dma.vmem_to_smem %s33_s26, 16, %s480_s28, [#allocation4]  }
   0xd   :  { %474 = dma.done.wait [#allocation4], 16  }
   0xe   :  { %475 = vsyncadd [#allocation4], 4294967280 }
   0xf   :  { %39 = sfence }
  0x10   :  { %v41_v0 = vld [vmem:[%s609_s0] sm:$0xff]  ;;  %v42_v1 = vld [vmem:[%s609_s0 + $0x8] sm:$0xff]  ;;  %vm56_vm0 = vcmask 1046528   ;;  %s481_s11 = smov 32   ;;  %v482_v7 = vmov 0.0   ;;  %s483_s0 = smov 64  }
  0x11   :  { %v53_v2 = vrot.slane %v42_v1, 1  ;;  %v398_v3 = vpack.i.bf16 %v42_v1, %v41_v0  ;;  %v408_v4 = vld [vmem:[%s611_s2] sm:$0xff]   ;;  %v52_v5 = vrot.slane %v41_v0, 1  ;;  %361 = vmatprep.subr.bf16.mxu0 %v482_v7  ;;  %v409_v9 = vld [vmem:[%s611_s2 + $0x8] sm:$0xff]   ;;  %v410_v11 = vld [vmem:[%s611_s2 + $0x10] sm:$0xff]   ;;  %vm484_vm1 = vmmov 0  }
  0x12   :  { %362 = vmatpush3.bf16.msra.mxu0 %v408_v4  ;;  %373 = vmatprep.mubr.msk.bf16.mxu0 %vm484_vm1, %v482_v7  ;;  %v411_v12 = vld [vmem:[%s611_s2 + $0x18] sm:$0xff]   ;;  %v412_v13 = vld [vmem:[%s611_s2 + $0x20] sm:$0xff]   ;;  %v413_v14 = vld [vmem:[%s611_s2 + $0x28] sm:$0xff]   ;;  %v46_v15 = vrot.slane %v42_v1, 7  ;;  %v45_v16 = vrot.slane %v41_v0, 7  ;;  %vm49_vm2 = vcmask 1040384  }
  0x13   :  { %399 = vrot.lane.b32.xlu0 %v398_v3, %s481_s11  ;;  %v58_v6 = vsel %vm56_vm0, %v53_v2, 0.0  ;;  %v57_v8 = vsel %vm56_vm0, %v52_v5, 0.0  ;;  %363 = vmatprep.subr.bf16.mxu0 %v482_v7  ;;  %vm73_vm3 = vcmask 261120   ;;  %vm76_vm4 = vcmask 523264   ;;  %v339_v31 = vld [vmem:[%s612_s3] ss:$0 sm:$0xff] }
  0x14   :  { %v403_v10 = vpack.i.bf16 %v58_v6, %v57_v8  ;;  %381 = vmatprep.mubr.msk.f32.mxu1 %vm484_vm1, %v482_v7  ;;  %v51_v20 = vsel %vm49_vm2, 0.0, %v46_v15  ;;  %v50_v21 = vsel %vm49_vm2, 0.0, %v45_v16  ;;  %vm135_vm5 = vcmask 785408   ;;  %vm386_vm6 = vmpackc.low %vm73_vm3, %vm73_vm3  ;;  %v184_v41 = vld [vmem:[%s613_s4] sm:$0xff]  ;;  %s486_s3 = smov [#allocation6]  }
  0x15   :  { %v485_v30 = vmov 0.0|0.0   ;;  %s323_s25 = sshll.u32 %s486_s3, 4  ;;  %s324_s25 = int_to_ptr.vmem [resolvable:$true] %s323_s25 }
  0x16   :  { %364 = vmatpush3.bf16.msra.mxu0 %v409_v9  ;;  %384 = vmatprep.subr.bf16.mxu1 %v485_v30  ;;  %s430_s26 = scalar_lea.vmem %s324_s25, 256  ;;  %p435_p6 = scmp.lt.s32.totalorder %s324_s25, %s324_s25 }
  0x17   :  { %404 = vrot.lane.b32.xlu0 %v403_v10, %s483_s0  ;;  %365 = vmatprep.subr.bf16.mxu0 %v482_v7  ;;  %p431_p5 = scmp.ne.s32.totalorder %s324_s25, %s430_s26  ;;  %p436_p7 = scmp.lt.s32.totalorder %s430_s26, %s430_s26 }
  0x19   :  { %p437_p8 = por %p436_p7, %p435_p6 }
  0x1a   :  { %366 = vmatpush3.bf16.msra.mxu0 %v410_v11 }
  0x1b   :  { %367 = vmatprep.subr.bf16.mxu0 %v482_v7  ;;  %p438_p9 = pnand %p437_p8, %p431_p5 }
  0x1e   :  { %368 = vmatpush3.bf16.msra.mxu0 %v411_v12 }
  0x1f   :  { %369 = vmatprep.subr.bf16.mxu0 %v482_v7 }
  0x22   :  { %370 = vmatpush3.bf16.msra.mxu0 %v412_v13 }
  0x23   :  { %371 = vmatprep.subr.bf16.mxu0 %v482_v7 }
  0x26   :  { %372 = vmatpush3.bf16.msra.mxu0 %v413_v14 }
  0x85   :  { %v400_v17 = vpop.permute.xlu0 %399 }
  0x86   :  { %v402_v18 = vunpack.i.h.bf16 %v400_v17  ;;  %v401_v19 = vunpack.i.l.bf16 %v400_v17 }
  0x88   :  { %v75_v25 = vsel %vm73_vm3, %v51_v20, %v402_v18  ;;  %v74_v26 = vsel %vm73_vm3, %v50_v21, %v401_v19 }
  0x89   :  { %v405_v22 = vpop.permute.xlu0 %404 }
  0x8a   :  { %v407_v23 = vunpack.i.h.bf16 %v405_v22  ;;  %v406_v24 = vunpack.i.l.bf16 %v405_v22 }
  0x8c   :  { %v78_v27 = vsel %vm76_vm4, %v75_v25, %v407_v23  ;;  %v77_v28 = vsel %vm76_vm4, %v74_v26, %v406_v24 }
  0x8d   :  { %v79_v29 = vpack.c.bf16 %v78_v27, %v77_v28 }
  0x8f   :  { %374 = vmatmul.mubr.msk.bf16.vlgmr.msra.gmra.mrb[0].mxu0 %vm135_vm5, %v79_v29 }
 0x162   :  { %v173_v32 = vpop.f32.mrb[0].mxu0 }
 0x163   :  { %v174_v33 = vadd.f32 %v339_v31, %v173_v32  ;;  %v375_v34 = vpop.f32.mrb[1].mxu0 }
 0x164   :  { %v176_v35 = vpop.f32.mrb[2].mxu0 }
 0x165   :  { %v180_v36 = vmax.f32 %v174_v33, 0.0  ;;  %v177_v37 = vadd.f32 %v339_v31, %v176_v35  ;;  %v376_v38 = vpop.f32.mrb[3].mxu0 }
 0x167   :  { %182 = vst.msk [vmem:[#allocation6] sm:$0xff] %vm73_vm3, %v180_v36  ;;  %v181_v39 = vmax.f32 %v177_v37, 0.0 }
 0x169   :  { %183 = vst.msk [vmem:[#allocation6 + $0x8] sm:$0xff] %vm73_vm3, %v181_v39  ;;  %v385_v40 = vpack.c.bf16 %v181_v39, %v180_v36 }
 0x16b   :  { %387 = vmatpush3.bf16.xpose.msk.msra.mxu1 %vm386_vm6, %v385_v40 }
 0x172   :  { %382 = vmatmul.mubr.msk.f32.vlgmr.msra.gmra.mrb[0].mxu1 %vm73_vm3, %v184_v41 }
 0x173   :  { %441 = shalt.err (!%p438_p9)
}
 0x174   :  { %s442_s29 = scalar_lea.hbm %s616_s7, 256 }
 0x175   :  { %p443_p10 = scmp.ne.s32.totalorder %s616_s7, %s442_s29  ;;  %p446_p11 = scmp.lt.u32.totalorder %s442_s29, %s616_s7 }
 0x177   :  { %p448_p12 = pnand %p446_p11, %p443_p10 }
 0x179   :  { %451 = shalt.err (!%p448_p12)
}
 0x17a   :  { %s487_s5 = smov 128   ;;  %s488_s10 = smov 8   ;;  %v274_v42 = vlaneseq  ;;  %v270_v43 = vld [vmem:[%s610_s1] sm:$0x1]  ;;  %vm302_vm8 = vcmask 1041408   ;;  %vm304_vm9 = vcmask 1042432  }
 0x17b   :  { %329 = dma.vmem_to_hbm [thread:$0]  %s324_s25, 256, %s616_s7, [#allocation7], %s487_s5, %s487_s5, %s488_s10   ;;  %v271_v44 = vsub.f32 1.0, %v270_v43  ;;  %vm306_vm10 = vcmask 125952  }
 0x17c   :  { %s264_s14 = sld [smem:[#allocation2]]  ;;  %s350_s15 = sld [smem:[#allocation2 + $0x1]]  ;;  %v275_v45 = vshrl.u32 %v274_v42, 7 }
 0x17d   :  { %v272_v46 = vmul.f32 -1000000.0, %v271_v44  ;;  %s489_s1 = smov [#allocation5]  }
 0x17e   :  { %v276_v47 = vsub.s32 0, %v275_v45  ;;  %s314_s7 = sshll.u32 %s489_s1, 4  ;;  %s315_s7 = int_to_ptr.vmem [resolvable:$true] %s314_s7 }
 0x17f   :  { %s452_s16 = scalar_lea.vmem %s315_s7, 64  ;;  %p457_p0 = scmp.lt.s32.totalorder %s315_s7, %s315_s7 }
 0x180   :  { %v277_v50 = vrot.slane %v272_v46, %v276_v47  ;;  %p453_p13 = scmp.ne.s32.totalorder %s315_s7, %s452_s16  ;;  %p458_p1 = scmp.lt.s32.totalorder %s452_s16, %s452_s16 }
 0x182   :  { %v265_v48 = vstv %s264_s14  ;;  %v268_v49 = vstv %s350_s15  ;;  %p459_p2 = por %p458_p1, %p457_p0 }
 0x184   :  { %p460_p3 = pnand %p459_p2, %p453_p13 }
 0x245   :  { %v260_v51 = vpop.f32.mrb[0].mxu1 }
 0x246   :  { %v266_v52 = vadd.f32 %v265_v48, %v260_v51  ;;  %v269_v53 = vadd.f32 %v268_v49, %v260_v51  ;;  %v383_v54 = vpop.f32.mrb[1].mxu1 }
 0x248   :  { %v279_v55 = vadd.f32 %v277_v50, %v269_v53  ;;  %v281_v56 = vrot.slane %v266_v52, 7  ;;  %v296_v3 = vrot.slane %v266_v52, 6 }
 0x24a   :  { %v283_v57 = vsub.f32 %v279_v55, %v281_v56  ;;  %v299_v4 = vrot.slane %v279_v55, 6 }
 0x24c   :  { %v286_v58 = vand.u32 2147483647, %v283_v57  ;;  %vm284_vm7 = vcmp.gt.f32.partialorder %v283_v57, 0.0 }
 0x24d   :  { %v285_v63 = vsel %vm284_vm7, 1.0, %v482_v7 }
 0x24e   :  { %v287_v59 = vsub.f32 0.0, %v286_v58  ;;  %v294_v1 = vrot.slane %v285_v63, 1 }
 0x250   :  { %v288_v60 = vmul.f32 1.442695, %v287_v59 }
 0x252   :  { %414 = vpow2.f32 %v288_v60 }
 0x25c   :  { %v415_v61 = vpop.eup %414 }
 0x25d   :  { %v290_v62 = vadd.f32 1.0, %v415_v61 }
 0x25f   :  { %416 = vlog2.f32 %v290_v62 }
 0x269   :  { %v417_v0 = vpop.eup %416 }
 0x26a   :  { %v292_v2 = vmul.f32 0.6931472, %v417_v0 }
 0x26c   :  { %v301_v5 = vsel %vm49_vm2, %v294_v1, %v292_v2 }
 0x26d   :  { %v303_v6 = vsel %vm302_vm8, %v301_v5, %v296_v3 }
 0x26e   :  { %v305_v8 = vsel %vm304_vm9, %v303_v6, %v299_v4 }
 0x26f   :  { %307 = vst.msk [vmem:[#allocation5] sm:$0xf] %vm306_vm10, %v305_v8 }
 0x270   :  { %463 = shalt.err (!%p460_p3)
}
 0x271   :  { %s464_s19 = scalar_lea.hbm %s615_s6, 64 }
 0x272   :  { %p465_p4 = scmp.ne.s32.totalorder %s615_s6, %s464_s19  ;;  %p468_p5 = scmp.lt.u32.totalorder %s464_s19, %s615_s6 }
 0x274   :  { %p470_p6 = pnand %p468_p5, %p465_p4 }
 0x276   :  { %473 = shalt.err (!%p470_p6)
}
 0x277   :  { %317 = dma.vmem_to_hbm [thread:$0]  %s315_s7, 64, %s615_s6, [#allocation3]  }
 0x278   :  { %476 = dma.done.wait [#allocation3], 64  }
 0x279   :  { %477 = vsyncadd [#allocation3], 4294967232 }
 0x27a   :  { %478 = dma.done.wait [#allocation7], 256  }
 0x27b   :  { %479 = vsyncadd [#allocation7], 4294967040 }
 0x27c   :  { %336 = vsyncpa [#allocation3], 1 }
 0x27d   :  { %337 = vsyncpa [#allocation7], 1 }
 0x27e   :  { %338 = vsyncpa [#allocation4], 1 }

</bundles_post_ra>
